<compile_context>
chip_gen: v5e
topology: v5e:2x2
jax: 0.10.0
libtpu: 0.0.40
codegen_flags: <defaults>
</compile_context>

<pallas_src>
import functools

import jax
import jax.numpy as jnp
from jax import lax
from jax.experimental import pallas as pl
from jax.experimental.pallas import tpu as pltpu


_INV_SQRT2 = 0.7071067811865476  # hoisted compile-time constant for exact GELU


def classifier_kernel(x_ref, w1_ref, b1_ref, gamma_ref, beta_ref,
                      w2_ref, b2_ref, o_ref):
    """One batch tile: Linear -> GELU(erf) -> LayerNorm(eps=1e-12) -> Linear."""
    x = x_ref[...]                                                       # [TB, D] f32

    # Linear 1 (MXU, fp32 accumulate) + bias
    h = jnp.dot(x, w1_ref[...], preferred_element_type=jnp.float32)     # [TB, H]
    h = h + b1_ref[...]                                                  # b1 is [1, H]

    # Exact (erf-based) GELU, matching torch.nn.GELU default; erf -> EUP.
    h = 0.5 * h * (1.0 + lax.erf(h * _INV_SQRT2))

    # FusedLayerNorm over last dim, eps = 1e-12.
    # mean/var via sum * (1/H) with a compile-time constant (no divides).
    inv_h = 1.0 / h.shape[-1]
    mean = jnp.sum(h, axis=-1, keepdims=True) * inv_h
    centered = h - mean
    var = jnp.sum(centered * centered, axis=-1, keepdims=True) * inv_h
    h = centered * lax.rsqrt(var + 1e-12) * gamma_ref[...] + beta_ref[...]

    # Linear 2 (MXU) + bias -> lane-dense (C padded to 128-multiple) logits
    out = jnp.dot(h, w2_ref[...], preferred_element_type=jnp.float32)   # [TB, Cp]
    o_ref[...] = (out + b2_ref[...]).astype(o_ref.dtype)


def _round_up(x, m):
    return (x + m - 1) // m * m


@functools.partial(jax.jit, static_argnames=("max_tile_b",))
def classifier_forward(x, params, *, max_tile_b=256):
    """x: [B, D] float32. params: dict of weights (see init_params)."""
    B, D = x.shape
    H = params["w1"].shape[1]          # 2*D
    C = params["w2"].shape[1]          # num_classes

    # ---- lane-dense output: pad C up to a multiple of 128 -------------------
    C_pad = _round_up(C, 128)
    w2 = params["w2"]
    b2 = params["b2"]
    if C_pad != C:
        w2 = jnp.pad(w2, ((0, 0), (0, C_pad - C)))
        b2 = jnp.pad(b2, ((0, 0), (0, C_pad - C)))

    # ---- large batch tile: whole (padded) batch if small, else 256 rows -----
    if B <= max_tile_b:
        tile_b = _round_up(B, 8)       # sublane-aligned, single grid step
        B_pad = tile_b
    else:
        tile_b = max_tile_b            # >=2 grid steps -> v7x can use both TCs
        B_pad = _round_up(B, tile_b)
    x_p = jnp.pad(x, ((0, B_pad - B), (0, 0))) if B_pad != B else x

    grid = (B_pad // tile_b,)

    # NOTE: for this problem size (D=128, H=256) the resident weights are tiny,
    # so the default scoped-VMEM limit is ample.  For large D on v7x (64 MiB
    # VMEM), add a K/H "arbitrary" grid axis for w1 and/or single-buffer the
    # grid-invariant weight specs (pipeline_mode=pl.Buffered(1)).
    out = pl.pallas_call(
        classifier_kernel,
        out_shape=jax.ShapeDtypeStruct((B_pad, C_pad), jnp.float32),
        grid_spec=pltpu.PrefetchScalarGridSpec(
            num_scalar_prefetch=0,
            grid=grid,
            in_specs=[
                pl.BlockSpec((tile_b, D), lambda i: (i, 0)),   # x tile
                pl.BlockSpec((D, H), lambda i: (0, 0)),        # w1 (resident)
                pl.BlockSpec((1, H), lambda i: (0, 0)),        # b1
                pl.BlockSpec((1, H), lambda i: (0, 0)),        # ln gamma
                pl.BlockSpec((1, H), lambda i: (0, 0)),        # ln beta
                pl.BlockSpec((H, C_pad), lambda i: (0, 0)),    # w2 (padded, resident)
                pl.BlockSpec((1, C_pad), lambda i: (0, 0)),    # b2 (padded)
            ],
            out_specs=pl.BlockSpec((tile_b, C_pad), lambda i: (i, 0)),
        ),
        compiler_params=pltpu.CompilerParams(
            dimension_semantics=("parallel",)),
    )(x_p, params["w1"], params["b1"], params["gamma"], params["beta"], w2, b2)

    # Slice back to the logical [B, num_classes] logits.
    return out[:B, :C]


def init_params(key, fusion_out_dim, num_classes):
    """Deterministic synthetic parameters matching the module's shapes."""
    D, H, C = fusion_out_dim, 2 * fusion_out_dim, num_classes
    k1, k2, k3, k4 = jax.random.split(key, 4)
    scale1 = 1.0 / jnp.sqrt(D)
    scale2 = 1.0 / jnp.sqrt(H)
    return {
        # stored as [in, out] (transpose of torch Linear weight)
        "w1": jax.random.uniform(k1, (D, H), jnp.float32, -scale1, scale1),
        "b1": jax.random.uniform(k2, (1, H), jnp.float32, -scale1, scale1),
        "gamma": jnp.ones((1, H), jnp.float32),
        "beta": jnp.zeros((1, H), jnp.float32),
        "w2": jax.random.uniform(k3, (H, C), jnp.float32, -scale2, scale2),
        "b2": jax.random.uniform(k4, (1, C), jnp.float32, -scale2, scale2),
    }


def reference_forward(x, p):
    """Pure-JAX reference for correctness check."""
    h = x @ p["w1"] + p["b1"]
    h = 0.5 * h * (1.0 + lax.erf(h / jnp.sqrt(2.0)))
    mean = jnp.mean(h, -1, keepdims=True)
    var = jnp.mean((h - mean) ** 2, -1, keepdims=True)
    h = (h - mean) * lax.rsqrt(var + 1e-12) * p["gamma"] + p["beta"]
    return h @ p["w2"] + p["b2"]


if __name__ == "__main__":
    # config.fusion_out_dim = 128, config.num_classes = 16, batch = 8
    FUSION_OUT_DIM = 128
    NUM_CLASSES = 16
    BATCH = 8

    key = jax.random.PRNGKey(0)
    kx, kp = jax.random.split(key)
    x = jax.random.normal(kx, (BATCH, FUSION_OUT_DIM), jnp.float32)
    params = init_params(kp, FUSION_OUT_DIM, NUM_CLASSES)

    out = classifier_forward(x, params)
    out = jax.block_until_ready(out)

    ref = reference_forward(x, params)
    assert out.shape == (BATCH, NUM_CLASSES)
    assert jnp.allclose(out, ref, atol=1e-4, rtol=1e-4)

    # TODO(synk): optional bf16 MXU inputs (2-4x MXU throughput) if the exact
    # fp32 parity / 1e-4 tolerance can be relaxed.
    print("KERNEL_OK")
</pallas_src>

<mosaic_0001>
module attributes {stable_mosaic.version = 11 : i64} {
  func.func @classifier_kernel(%arg0: i32, %arg1: memref<8x128xf32, #tpu.memory_space<vmem>>, %arg2: memref<128x256xf32, #tpu.memory_space<vmem>>, %arg3: memref<1x256xf32, #tpu.memory_space<vmem>>, %arg4: memref<1x256xf32, #tpu.memory_space<vmem>>, %arg5: memref<1x256xf32, #tpu.memory_space<vmem>>, %arg6: memref<256x128xf32, #tpu.memory_space<vmem>>, %arg7: memref<1x128xf32, #tpu.memory_space<vmem>>, %arg8: memref<8x128xf32, #tpu.memory_space<vmem>>) attributes {dimension_semantics = [#tpu.dimension_semantics<parallel>], iteration_bounds = array<i64: 1>, scalar_prefetch = 0 : i64, scratch_operands = 0 : i64, tpu.core_type = #tpu.core_type<tc>, window_params = [{transform_indices = @transform_0, window_bounds = array<i64: 8, 128>}, {pipeline_mode = #tpu.pipeline_mode<synchronous>, transform_indices = @transform_1, window_bounds = array<i64: 128, 256>}, {pipeline_mode = #tpu.pipeline_mode<synchronous>, transform_indices = @transform_2, window_bounds = array<i64: 1, 256>}, {pipeline_mode = #tpu.pipeline_mode<synchronous>, transform_indices = @transform_3, window_bounds = array<i64: 1, 256>}, {pipeline_mode = #tpu.pipeline_mode<synchronous>, transform_indices = @transform_4, window_bounds = array<i64: 1, 256>}, {pipeline_mode = #tpu.pipeline_mode<synchronous>, transform_indices = @transform_5, window_bounds = array<i64: 256, 128>}, {pipeline_mode = #tpu.pipeline_mode<synchronous>, transform_indices = @transform_6, window_bounds = array<i64: 1, 128>}, {transform_indices = @transform_7, window_bounds = array<i64: 8, 128>}]} {
    %c0 = arith.constant 0 : index
    %c0_0 = arith.constant 0 : index
    %0 = vector.load %arg1[%c0, %c0_0] : memref<8x128xf32, #tpu.memory_space<vmem>>, vector<8x128xf32>
    %c0_1 = arith.constant 0 : index
    %c0_2 = arith.constant 0 : index
    %1 = vector.load %arg2[%c0_1, %c0_2] : memref<128x256xf32, #tpu.memory_space<vmem>>, vector<128x256xf32>
    %cst = arith.constant dense<0.000000e+00> : vector<8x256xf32>
    %2 = tpu.matmul %0, %1, %cst {dimension_numbers = #tpu.dot_dimension_numbers<[1], [0], [0], [1], [0, 0, 1, 1], [], []>} : vector<8x128xf32>, vector<128x256xf32>, vector<8x256xf32> -> vector<8x256xf32>
    %c0_3 = arith.constant 0 : index
    %c0_4 = arith.constant 0 : index
    %3 = vector.load %arg3[%c0_3, %c0_4] : memref<1x256xf32, #tpu.memory_space<vmem>>, vector<1x256xf32>
    %4 = vector.broadcast %3 : vector<1x256xf32> to vector<8x256xf32>
    %5 = arith.addf %2, %4 : vector<8x256xf32>
    %cst_5 = arith.constant 5.000000e-01 : f32
    %6 = vector.broadcast %cst_5 : f32 to vector<8x256xf32>
    %7 = arith.mulf %6, %5 : vector<8x256xf32>
    %cst_6 = arith.constant 0.707106769 : f32
    %8 = vector.broadcast %cst_6 : f32 to vector<8x256xf32>
    %9 = arith.mulf %5, %8 : vector<8x256xf32>
    %10 = math.erf %9 : vector<8x256xf32>
    %cst_7 = arith.constant 1.000000e+00 : f32
    %11 = vector.broadcast %cst_7 : f32 to vector<8x256xf32>
    %12 = arith.addf %11, %10 : vector<8x256xf32>
    %13 = arith.mulf %7, %12 : vector<8x256xf32>
    %cst_8 = arith.constant dense<0.000000e+00> : vector<8xf32>
    %14 = vector.multi_reduction <add>, %13, %cst_8 [1] : vector<8x256xf32> to vector<8xf32>
    %15 = vector.shape_cast %14 : vector<8xf32> to vector<8x1xf32>
    %cst_9 = arith.constant 3.906250e-03 : f32
    %16 = vector.broadcast %cst_9 : f32 to vector<8x1xf32>
    %17 = arith.mulf %15, %16 : vector<8x1xf32>
    %18 = vector.broadcast %17 : vector<8x1xf32> to vector<8x256xf32>
    %19 = arith.subf %13, %18 : vector<8x256xf32>
    %20 = arith.mulf %19, %19 : vector<8x256xf32>
    %cst_10 = arith.constant dense<0.000000e+00> : vector<8xf32>
    %21 = vector.multi_reduction <add>, %20, %cst_10 [1] : vector<8x256xf32> to vector<8xf32>
    %22 = vector.shape_cast %21 : vector<8xf32> to vector<8x1xf32>
    %cst_11 = arith.constant 3.906250e-03 : f32
    %23 = vector.broadcast %cst_11 : f32 to vector<8x1xf32>
    %24 = arith.mulf %22, %23 : vector<8x1xf32>
    %cst_12 = arith.constant 9.99999996E-13 : f32
    %25 = vector.broadcast %cst_12 : f32 to vector<8x1xf32>
    %26 = arith.addf %24, %25 : vector<8x1xf32>
    %27 = math.rsqrt %26 : vector<8x1xf32>
    %28 = vector.broadcast %27 : vector<8x1xf32> to vector<8x256xf32>
    %29 = arith.mulf %19, %28 : vector<8x256xf32>
    %c0_13 = arith.constant 0 : index
    %c0_14 = arith.constant 0 : index
    %30 = vector.load %arg4[%c0_13, %c0_14] : memref<1x256xf32, #tpu.memory_space<vmem>>, vector<1x256xf32>
    %31 = vector.broadcast %30 : vector<1x256xf32> to vector<8x256xf32>
    %32 = arith.mulf %29, %31 : vector<8x256xf32>
    %c0_15 = arith.constant 0 : index
    %c0_16 = arith.constant 0 : index
    %33 = vector.load %arg5[%c0_15, %c0_16] : memref<1x256xf32, #tpu.memory_space<vmem>>, vector<1x256xf32>
    %34 = vector.broadcast %33 : vector<1x256xf32> to vector<8x256xf32>
    %35 = arith.addf %32, %34 : vector<8x256xf32>
    %c0_17 = arith.constant 0 : index
    %c0_18 = arith.constant 0 : index
    %36 = vector.load %arg6[%c0_17, %c0_18] : memref<256x128xf32, #tpu.memory_space<vmem>>, vector<256x128xf32>
    %cst_19 = arith.constant dense<0.000000e+00> : vector<8x128xf32>
    %37 = tpu.matmul %35, %36, %cst_19 {dimension_numbers = #tpu.dot_dimension_numbers<[1], [0], [0], [1], [0, 0, 1, 1], [], []>} : vector<8x256xf32>, vector<256x128xf32>, vector<8x128xf32> -> vector<8x128xf32>
    %c0_20 = arith.constant 0 : index
    %c0_21 = arith.constant 0 : index
    %38 = vector.load %arg7[%c0_20, %c0_21] : memref<1x128xf32, #tpu.memory_space<vmem>>, vector<1x128xf32>
    %39 = vector.broadcast %38 : vector<1x128xf32> to vector<8x128xf32>
    %40 = arith.addf %37, %39 : vector<8x128xf32>
    %c0_22 = arith.constant 0 : index
    %c0_23 = arith.constant 0 : index
    %41 = vector.load %arg8[%c0_22, %c0_23] : memref<8x128xf32, #tpu.memory_space<vmem>>, vector<8x128xf32>
    tpu.vector_store %arg8[%c0_22, %c0_23], %40 {strides = array<i32>} : memref<8x128xf32, #tpu.memory_space<vmem>>, vector<8x128xf32>,
    return
  }
  func.func @transform_0(%arg0: i32) -> (i32, i32) {
    %c0_i32 = arith.constant 0 : i32
    %c0_i32_0 = arith.constant 0 : i32
    return %arg0, %c0_i32 : i32, i32
  }
  func.func @transform_1(%arg0: i32) -> (i32, i32) {
    %c0_i32 = arith.constant 0 : i32
    %c0_i32_0 = arith.constant 0 : i32
    %c0_i32_1 = arith.constant 0 : i32
    return %c0_i32, %c0_i32_0 : i32, i32
  }
  func.func @transform_2(%arg0: i32) -> (i32, i32) {
    %c0_i32 = arith.constant 0 : i32
    %c0_i32_0 = arith.constant 0 : i32
    %c0_i32_1 = arith.constant 0 : i32
    return %c0_i32, %c0_i32_0 : i32, i32
  }
  func.func @transform_3(%arg0: i32) -> (i32, i32) {
    %c0_i32 = arith.constant 0 : i32
    %c0_i32_0 = arith.constant 0 : i32
    %c0_i32_1 = arith.constant 0 : i32
    return %c0_i32, %c0_i32_0 : i32, i32
  }
  func.func @transform_4(%arg0: i32) -> (i32, i32) {
    %c0_i32 = arith.constant 0 : i32
    %c0_i32_0 = arith.constant 0 : i32
    %c0_i32_1 = arith.constant 0 : i32
    return %c0_i32, %c0_i32_0 : i32, i32
  }
  func.func @transform_5(%arg0: i32) -> (i32, i32) {
    %c0_i32 = arith.constant 0 : i32
    %c0_i32_0 = arith.constant 0 : i32
    %c0_i32_1 = arith.constant 0 : i32
    return %c0_i32, %c0_i32_0 : i32, i32
  }
  func.func @transform_6(%arg0: i32) -> (i32, i32) {
    %c0_i32 = arith.constant 0 : i32
    %c0_i32_0 = arith.constant 0 : i32
    %c0_i32_1 = arith.constant 0 : i32
    return %c0_i32, %c0_i32_0 : i32, i32
  }
  func.func @transform_7(%arg0: i32) -> (i32, i32) {
    %c0_i32 = arith.constant 0 : i32
    %c0_i32_0 = arith.constant 0 : i32
    return %arg0, %c0_i32 : i32, i32
  }
}

</mosaic_0001>

<bundles_post_ra>
// kernel: classifier_forward.1
= control target key start
LH: loop header
LB: loop body
LE: loop exit
PB: predicated region body
PF: predicated region fallthrough
CT: control target
= control target key end

     0   :  { %s643_s0 = inlined_call_operand.vmem [shape: f32[8,128], index: 0, kind: input, shape index: {}]   ;;  %s644_s1 = inlined_call_operand.vmem [shape: f32[128,256], index: 1, kind: input, shape index: {}]   ;;  %s645_s2 = inlined_call_operand.vmem [shape: f32[1,256], index: 2, kind: input, shape index: {}]   ;;  %s646_s3 = inlined_call_operand.vmem [shape: f32[1,256], index: 3, kind: input, shape index: {}]   ;;  %s647_s4 = inlined_call_operand.vmem [shape: f32[1,256], index: 4, kind: input, shape index: {}]   ;;  %s648_s5 = inlined_call_operand.vmem [shape: f32[256,128], index: 5, kind: input, shape index: {}]   ;;  %s649_s6 = inlined_call_operand.vmem [shape: f32[1,128], index: 6, kind: input, shape index: {}]   ;;  %s650_s7 = inlined_call_operand.hbm [shape: f32[8,128], index: 7, kind: output, shape index: {}]  }
   0x1   :  { %v58_v0 = vld [vmem:[%s644_s1 + $0xf0] sm:$0xff]  ;;  %v59_v1 = vld [vmem:[%s644_s1 + $0xf8] sm:$0xff]  ;;  %v56_v2 = vld [vmem:[%s644_s1 + $0xe0] sm:$0xff] }
   0x2   :  { %66 = vmatpush.msra.mxu0 %v58_v0  ;;  %86 = vmatpush.msra.mxu1 %v59_v1  ;;  %v57_v3 = vld [vmem:[%s644_s1 + $0xe8] sm:$0xff]  ;;  %v54_v4 = vld [vmem:[%s644_s1 + $0xd0] sm:$0xff]  ;;  %v55_v5 = vld [vmem:[%s644_s1 + $0xd8] sm:$0xff] }
   0x3   :  { %v52_v6 = vld [vmem:[%s644_s1 + $0xc0] sm:$0xff]  ;;  %v53_v7 = vld [vmem:[%s644_s1 + $0xc8] sm:$0xff]  ;;  %v50_v8 = vld [vmem:[%s644_s1 + $0xb0] sm:$0xff] }
   0x4   :  { %67 = vmatpush.msra.mxu0 %v56_v2  ;;  %87 = vmatpush.msra.mxu1 %v57_v3  ;;  %v51_v9 = vld [vmem:[%s644_s1 + $0xb8] sm:$0xff]  ;;  %v48_v10 = vld [vmem:[%s644_s1 + $0xa0] sm:$0xff]  ;;  %v49_v11 = vld [vmem:[%s644_s1 + $0xa8] sm:$0xff] }
   0x5   :  { %v46_v12 = vld [vmem:[%s644_s1 + $0x90] sm:$0xff]  ;;  %v47_v13 = vld [vmem:[%s644_s1 + $0x98] sm:$0xff] }
   0x6   :  { %68 = vmatpush.msra.mxu0 %v54_v4  ;;  %88 = vmatpush.msra.mxu1 %v55_v5 }
   0x8   :  { %69 = vmatpush.msra.mxu0 %v52_v6  ;;  %89 = vmatpush.msra.mxu1 %v53_v7 }
   0xa   :  { %70 = vmatpush.msra.mxu0 %v50_v8  ;;  %90 = vmatpush.msra.mxu1 %v51_v9 }
   0xc   :  { %71 = vmatpush.msra.mxu0 %v48_v10  ;;  %91 = vmatpush.msra.mxu1 %v49_v11 }
   0xd   :  { %12 = vsyncpa [#allocation3], 0  ;;  %v44_v14 = vld [vmem:[%s644_s1 + $0x80] sm:$0xff]  ;;  %v45_v15 = vld [vmem:[%s644_s1 + $0x88] sm:$0xff]  ;;  %s319_s16 = sshll.u32 %s650_s7, 4  ;;  %s320_s16 = int_to_ptr.hbm [resolvable:$true] %s319_s16 }
   0xe   :  { %72 = vmatpush.msra.mxu0 %v46_v12  ;;  %92 = vmatpush.msra.mxu1 %v47_v13  ;;  %v42_v16 = vld [vmem:[%s644_s1 + $0x70] sm:$0xff]  ;;  %v43_v17 = vld [vmem:[%s644_s1 + $0x78] sm:$0xff]  ;;  %v40_v18 = vld [vmem:[%s644_s1 + $0x60] sm:$0xff] }
   0xf   :  { %v41_v19 = vld [vmem:[%s644_s1 + $0x68] sm:$0xff]  ;;  %v38_v20 = vld [vmem:[%s644_s1 + $0x50] sm:$0xff]  ;;  %v39_v21 = vld [vmem:[%s644_s1 + $0x58] sm:$0xff] }
  0x10   :  { %73 = vmatpush.msra.mxu0 %v44_v14  ;;  %93 = vmatpush.msra.mxu1 %v45_v15  ;;  %v36_v22 = vld [vmem:[%s644_s1 + $0x40] sm:$0xff]  ;;  %v37_v23 = vld [vmem:[%s644_s1 + $0x48] sm:$0xff]  ;;  %v34_v24 = vld [vmem:[%s644_s1 + $0x30] sm:$0xff] }
  0x11   :  { %v35_v25 = vld [vmem:[%s644_s1 + $0x38] sm:$0xff]  ;;  %v32_v26 = vld [vmem:[%s644_s1 + $0x20] sm:$0xff]  ;;  %v33_v27 = vld [vmem:[%s644_s1 + $0x28] sm:$0xff] }
  0x12   :  { %74 = vmatpush.msra.mxu0 %v42_v16  ;;  %94 = vmatpush.msra.mxu1 %v43_v17  ;;  %v30_v28 = vld [vmem:[%s644_s1 + $0x10] sm:$0xff]  ;;  %v31_v29 = vld [vmem:[%s644_s1 + $0x18] sm:$0xff]  ;;  %v28_v30 = vld [vmem:[%s644_s1] sm:$0xff] }
  0x13   :  { %v29_v31 = vld [vmem:[%s644_s1 + $0x8] sm:$0xff]  ;;  %v27_v32 = vld [vmem:[%s643_s0] sm:$0xff] }
  0x14   :  { %75 = vmatpush.msra.mxu0 %v40_v18  ;;  %95 = vmatpush.msra.mxu1 %v41_v19  ;;  %v60_v33 = vld [vmem:[%s645_s2] sm:$0x3] }
  0x15   :  { %v62_v34 = vperm.slane %v60_v33, 0  ;;  %v63_v35 = vperm.slane %v60_v33, 1 }
  0x16   :  { %76 = vmatpush.msra.mxu0 %v38_v20  ;;  %96 = vmatpush.msra.mxu1 %v39_v21 }
  0x18   :  { %77 = vmatpush.msra.mxu0 %v36_v22  ;;  %97 = vmatpush.msra.mxu1 %v37_v23 }
  0x1a   :  { %78 = vmatpush.msra.mxu0 %v34_v24  ;;  %98 = vmatpush.msra.mxu1 %v35_v25 }
  0x1c   :  { %79 = vmatpush.msra.mxu0 %v32_v26  ;;  %99 = vmatpush.msra.mxu1 %v33_v27 }
  0x1e   :  { %80 = vmatpush.msra.mxu0 %v30_v28  ;;  %100 = vmatpush.msra.mxu1 %v31_v29 }
  0x20   :  { %81 = vmatpush.msra.mxu0 %v28_v30  ;;  %101 = vmatpush.msra.mxu1 %v29_v31 }
  0x21   :  { %82 = vmatmul.f32.vlgmr.msra.gmra.mxu0 %v27_v32  ;;  %102 = vmatmul.f32.vlgmr.msra.gmra.mxu1 %v27_v32 }
  0x9e   :  { %v83_v36 = vpop.f32.mrf.mxu0  ;;  %v103_v37 = vpop.f32.mrf.mxu1 }
  0x9f   :  { %v507_v38 = vadd.f32 %v83_v36, %v62_v34  ;;  %v509_v39 = vadd.f32 %v103_v37, %v63_v35 }
  0xa1   :  { %v512_v40 = vmul.f32 0.70710677, %v507_v38  ;;  %v515_v41 = vmul.f32 0.70710677, %v509_v39 }
  0xa3   :  { %v110_v42 = vmul.f32 %v512_v40, %v512_v40  ;;  %v150_v43 = vmul.f32 %v515_v41, %v515_v41 }
  0xa5   :  { %v111_v44 = vmin.f32 %v110_v42, 16.0  ;;  %v151_v45 = vmin.f32 %v150_v43, 16.0 }
  0xa7   :  { %v112_v46 = vmul.f32 2.1237322e-06, %v111_v44  ;;  %v152_v47 = vmul.f32 2.1237322e-06, %v151_v45  ;;  %v123_v48 = vmul.f32 3.8918573e-05, %v111_v44 }
  0xa8   :  { %v163_v49 = vmul.f32 3.8918573e-05, %v151_v45 }
  0xa9   :  { %v113_v50 = vadd.f32 0.00028619796, %v112_v46  ;;  %v153_v51 = vadd.f32 0.00028619796, %v152_v47  ;;  %v124_v52 = vadd.f32 0.001143296, %v123_v48 }
  0xaa   :  { %v164_v53 = vadd.f32 0.001143296, %v163_v49 }
  0xab   :  { %v114_v54 = vmul.f32 %v113_v50, %v111_v44  ;;  %v154_v55 = vmul.f32 %v153_v51, %v151_v45  ;;  %v125_v56 = vmul.f32 %v124_v52, %v111_v44  ;;  %v106_v52 = vmul.f32 0.5, %v507_v38  ;;  %v249_v38 = vld [vmem:[%s648_s5 + $0x70] sm:$0xff] }
  0xac   :  { %v165_v57 = vmul.f32 %v164_v53, %v151_v45 }
  0xad   :  { %v115_v58 = vadd.f32 0.0036580483, %v114_v54  ;;  %v126_v59 = vadd.f32 0.014752088, %v125_v56  ;;  %v155_v61 = vadd.f32 0.0036580483, %v154_v55 }
  0xae   :  { %v166_v60 = vadd.f32 0.014752088, %v165_v57  ;;  %v107_v54 = vmul.f32 0.5, %v509_v39  ;;  %v265_v39 = vld [vmem:[%s648_s5 + $0xf0] sm:$0xff] }
  0xaf   :  { %v127_v62 = vmul.f32 %v126_v59, %v111_v44  ;;  %v116_v0 = vmul.f32 %v115_v58, %v111_v44  ;;  %v156_v3 = vmul.f32 %v155_v61, %v151_v45  ;;  %v266_v58 = vld [vmem:[%s648_s5 + $0xf8] sm:$0xff] }
  0xb0   :  { %v167_v63 = vmul.f32 %v166_v60, %v151_v45  ;;  %291 = vmatpush.msra.mxu3 %v266_v58 }
  0xb1   :  { %v128_v1 = vadd.f32 0.112945676, %v127_v62  ;;  %v117_v6 = vadd.f32 0.05243302, %v116_v0  ;;  %v157_v9 = vadd.f32 0.05243302, %v156_v3 }
  0xb2   :  { %v168_v2 = vadd.f32 0.112945676, %v167_v63  ;;  %292 = vmatpush.msra.mxu3 %v265_v39  ;;  %v264_v3 = vld [vmem:[%s648_s5 + $0xe8] sm:$0xff] }
  0xb3   :  { %v129_v4 = vmul.f32 %v128_v1, %v111_v44  ;;  %v118_v12 = vmul.f32 %v117_v6, %v111_v44  ;;  %v158_v15 = vmul.f32 %v157_v9, %v151_v45  ;;  %v246_v6 = vld [vmem:[%s648_s5 + $0x58] sm:$0xff]  ;;  %v261_v9 = vld [vmem:[%s648_s5 + $0xd0] sm:$0xff] }
  0xb4   :  { %v169_v5 = vmul.f32 %v168_v2, %v151_v45  ;;  %v248_v2 = vld [vmem:[%s648_s5 + $0x68] sm:$0xff]  ;;  %293 = vmatpush.msra.mxu3 %v264_v3 }
  0xb5   :  { %v130_v7 = vadd.f32 0.4994258, %v129_v4  ;;  %v119_v16 = vadd.f32 0.18741608, %v118_v12  ;;  %v159_v17 = vadd.f32 0.18741608, %v158_v15 }
  0xb6   :  { %v170_v8 = vadd.f32 0.4994258, %v169_v5  ;;  %v247_v4 = vld [vmem:[%s648_s5 + $0x60] sm:$0xff]  ;;  %v258_v15 = vld [vmem:[%s648_s5 + $0xb8] sm:$0xff] }
  0xb7   :  { %v131_v10 = vmul.f32 %v130_v7, %v111_v44  ;;  %v120_v19 = vmul.f32 %v119_v16, %v111_v44  ;;  %v160_v22 = vmul.f32 %v159_v17, %v151_v45  ;;  %v263_v5 = vld [vmem:[%s648_s5 + $0xe0] sm:$0xff]  ;;  %v262_v7 = vld [vmem:[%s648_s5 + $0xd8] sm:$0xff]  ;;  %v241_v16 = vld [vmem:[%s648_s5 + $0x30] sm:$0xff] }
  0xb8   :  { %v171_v11 = vmul.f32 %v170_v8, %v151_v45  ;;  %294 = vmatpush.msra.mxu3 %v263_v5  ;;  %v245_v8 = vld [vmem:[%s648_s5 + $0x50] sm:$0xff]  ;;  %v243_v12 = vld [vmem:[%s648_s5 + $0x40] sm:$0xff] }
  0xb9   :  { %v132_v13 = vadd.f32 1.0, %v131_v10  ;;  %v121_v25 = vadd.f32 1.1283791, %v120_v19  ;;  %v161_v31 = vadd.f32 1.1283791, %v160_v22  ;;  %v244_v10 = vld [vmem:[%s648_s5 + $0x48] sm:$0xff] }
  0xba   :  { %v172_v14 = vadd.f32 1.0, %v171_v11  ;;  %295 = vmatpush.msra.mxu3 %v262_v7  ;;  %v260_v11 = vld [vmem:[%s648_s5 + $0xc8] sm:$0xff]  ;;  %v257_v17 = vld [vmem:[%s648_s5 + $0xb0] sm:$0xff]  ;;  %v238_v22 = vld [vmem:[%s648_s5 + $0x18] sm:$0xff] }
  0xbb   :  { %332 = vrcp.f32 %v132_v13  ;;  %v144_v26 = vand.u32 2147483648, %v132_v13  ;;  %v142_v29 = vand.u32 2147483647, %v132_v13  ;;  %vm138_vm2 = vweird.f32 %v132_v13  ;;  %v256_v19 = vld [vmem:[%s648_s5 + $0xa8] sm:$0xff] }
  0xbc   :  { %334 = vrcp.f32 %v172_v14  ;;  %v184_v30 = vand.u32 2147483648, %v172_v14  ;;  %v182_v33 = vand.u32 2147483647, %v172_v14  ;;  %vm178_vm4 = vweird.f32 %v172_v14  ;;  %296 = vmatpush.msra.mxu3 %v261_v9 }
  0xbd   :  { %v145_v35 = vor.u32 1.1754944e-38, %v144_v26  ;;  %v122_v37 = vmul.f32 %v121_v25, %v512_v40  ;;  %vm143_vm5 = vcmp.eq.f32.partialorder %v142_v29, 8.507059e+37  ;;  %v162_v44 = vmul.f32 %v161_v31, %v515_v41  ;;  %v250_v41 = vld [vmem:[%s648_s5 + $0x78] sm:$0xff]  ;;  %v253_v25 = vld [vmem:[%s648_s5 + $0x90] sm:$0xff]  ;;  %v236_v26 = vld [vmem:[%s648_s5 + $0x8] sm:$0xff] }
  0xbe   :  { %v185_v43 = vor.u32 1.1754944e-38, %v184_v30  ;;  %vm183_vm7 = vcmp.eq.f32.partialorder %v182_v33, 8.507059e+37  ;;  %271 = vmatpush.msra.mxu2 %v250_v41  ;;  %297 = vmatpush.msra.mxu3 %v260_v11  ;;  %v251_v29 = vld [vmem:[%s648_s5 + $0x80] sm:$0xff] }
  0xc0   :  { %272 = vmatpush.msra.mxu2 %v249_v38 }
  0xc1   :  { %v333_v18 = vpop.eup %332 }
  0xc2   :  { %v335_v20 = vpop.eup %334  ;;  %v134_v21 = vmul.f32 %v333_v18, %v132_v13  ;;  %vm139_vm0 = vweird.f32 %v333_v18  ;;  %273 = vmatpush.msra.mxu2 %v248_v2  ;;  %v259_v13 = vld [vmem:[%s648_s5 + $0xc0] sm:$0xff] }
  0xc3   :  { %v174_v23 = vmul.f32 %v335_v20, %v172_v14  ;;  %vm179_vm1 = vweird.f32 %v335_v20  ;;  %vm140_vm3 = vmor %vm138_vm2, %vm139_vm0  ;;  %298 = vmatpush.msra.mxu3 %v259_v13  ;;  %v242_v14 = vld [vmem:[%s648_s5 + $0x38] sm:$0xff] }
  0xc4   :  { %v135_v24 = vsub.f32 1.0, %v134_v21  ;;  %vm180_vm6 = vmor %vm178_vm4, %vm179_vm1  ;;  %274 = vmatpush.msra.mxu2 %v247_v4  ;;  %v255_v21 = vld [vmem:[%s648_s5 + $0xa0] sm:$0xff] }
  0xc5   :  { %v175_v27 = vsub.f32 1.0, %v174_v23  ;;  %299 = vmatpush.msra.mxu3 %v258_v15  ;;  %v254_v23 = vld [vmem:[%s648_s5 + $0x98] sm:$0xff] }
  0xc6   :  { %v136_v28 = vmul.f32 %v333_v18, %v135_v24  ;;  %275 = vmatpush.msra.mxu2 %v246_v6  ;;  %v237_v24 = vld [vmem:[%s648_s5 + $0x10] sm:$0xff] }
  0xc7   :  { %v176_v32 = vmul.f32 %v335_v20, %v175_v27  ;;  %300 = vmatpush.msra.mxu3 %v257_v17  ;;  %v252_v27 = vld [vmem:[%s648_s5 + $0x88] sm:$0xff] }
  0xc8   :  { %v137_v34 = vadd.f32 %v333_v18, %v136_v28  ;;  %276 = vmatpush.msra.mxu2 %v245_v8  ;;  %v235_v28 = vld [vmem:[%s648_s5] sm:$0xff] }
  0xc9   :  { %v177_v36 = vadd.f32 %v335_v20, %v176_v32  ;;  %301 = vmatpush.msra.mxu3 %v256_v19 }
  0xca   :  { %v141_v42 = vsel %vm140_vm3, %v333_v18, %v137_v34  ;;  %277 = vmatpush.msra.mxu2 %v244_v10  ;;  %v240_v18 = vld [vmem:[%s648_s5 + $0x28] sm:$0xff] }
  0xcb   :  { %v146_v45 = vsel %vm143_vm5, %v145_v35, %v141_v42  ;;  %v181_v46 = vsel %vm180_vm6, %v335_v20, %v177_v36  ;;  %v239_v20 = vld [vmem:[%s648_s5 + $0x20] sm:$0xff]  ;;  %302 = vmatpush.msra.mxu3 %v255_v21 }
  0xcc   :  { %v147_v47 = vmul.f32 %v146_v45, %v122_v37  ;;  %v186_v48 = vsel %vm183_vm7, %v185_v43, %v181_v46  ;;  %278 = vmatpush.msra.mxu2 %v243_v12  ;;  %v219_v42 = vld [vmem:[%s646_s3] sm:$0x3] }
  0xcd   :  { %v187_v49 = vmul.f32 %v186_v48, %v162_v44  ;;  %303 = vmatpush.msra.mxu3 %v254_v23  ;;  %v227_v44 = vld [vmem:[%s647_s4] sm:$0x3]  ;;  %v221_v45 = vperm.slane %v219_v42, 0  ;;  %v222_v46 = vperm.slane %v219_v42, 1  ;;  %s364_s4 = smov [#allocation2]  }
  0xce   :  { %v328_v50 = vclamps-f32 %v147_v47, 1.0  ;;  %279 = vmatpush.msra.mxu2 %v242_v14  ;;  %s317_s13 = sshll.u32 %s364_s4, 4  ;;  %s318_s13 = int_to_ptr.vmem [resolvable:$true] %s317_s13 }
  0xcf   :  { %v329_v51 = vclamps-f32 %v187_v49, 1.0  ;;  %304 = vmatpush.msra.mxu3 %v253_v25  ;;  %v229_v49 = vperm.slane %v227_v44, 0 }
  0xd0   :  { %v190_v53 = vadd.f32 1.0, %v328_v50  ;;  %280 = vmatpush.msra.mxu2 %v241_v16 }
  0xd1   :  { %v191_v40 = vadd.f32 1.0, %v329_v51  ;;  %305 = vmatpush.msra.mxu3 %v252_v27  ;;  %v230_v51 = vperm.slane %v227_v44, 1 }
  0xd2   :  { %v192_v55 = vmul.f32 %v190_v53, %v106_v52  ;;  %281 = vmatpush.msra.mxu2 %v240_v18 }
  0xd3   :  { %v193_v56 = vmul.f32 %v191_v40, %v107_v54  ;;  %306 = vmatpush.msra.mxu3 %v251_v29 }
  0xd4   :  { %282 = vmatpush.msra.mxu2 %v239_v20 }
  0xd5   :  { %v194_v57 = vadd.f32 %v193_v56, %v192_v55 }
  0xd6   :  { %283 = vmatpush.msra.mxu2 %v238_v22 }
  0xd7   :  { %195 = vadd.xlane.f32.xlu0 %v194_v57 }
  0xd8   :  { %284 = vmatpush.msra.mxu2 %v237_v24 }
  0xda   :  { %285 = vmatpush.msra.mxu2 %v236_v26 }
  0xdc   :  { %286 = vmatpush.msra.mxu2 %v235_v28 }
 0x14a   :  { %v196_v59 = vpop.xlane.xlu0 %195 }
 0x14b   :  { %v197_v60 = vmul.f32 0.00390625, %v196_v59 }
 0x14d   :  { %v537_v61 = vsub.f32 %v192_v55, %v197_v60  ;;  %v539_v62 = vsub.f32 %v193_v56, %v197_v60  ;;  %v331_v55 = vld [vmem:[%s649_s6] ss:$0 sm:$0xff] }
 0x14f   :  { %v200_v63 = vmul.f32 %v537_v61, %v537_v61  ;;  %v201_v0 = vmul.f32 %v539_v62, %v539_v62 }
 0x151   :  { %v202_v1 = vadd.f32 %v201_v0, %v200_v63 }
 0x153   :  { %203 = vadd.xlane.f32.xlu0 %v202_v1 }
 0x1c6   :  { %v204_v30 = vpop.xlane.xlu0 %203 }
 0x1c7   :  { %v205_v31 = vmul.f32 0.00390625, %v204_v30 }
 0x1c9   :  { %v206_v32 = vadd.f32 1e-12, %v205_v31 }
 0x1cb   :  { %336 = vrsqrt.f32 %v206_v32  ;;  %vm213_vm9 = vweird.f32 %v206_v32 }
 0x1d1   :  { %v337_v33 = vpop.eup %336 }
 0x1d2   :  { %v208_v34 = vmul.f32 %v337_v33, %v206_v32  ;;  %vm214_vm8 = vweird.f32 %v337_v33 }
 0x1d3   :  { %vm215_vm10 = vmor %vm213_vm9, %vm214_vm8 }
 0x1d4   :  { %v209_v35 = vmul.f32 %v337_v33, %v208_v34 }
 0x1d6   :  { %v210_v36 = vmul.f32 0.5, %v209_v35 }
 0x1d8   :  { %v211_v37 = vsub.f32 1.5, %v210_v36 }
 0x1da   :  { %v212_v43 = vmul.f32 %v337_v33, %v211_v37 }
 0x1dc   :  { %v216_v47 = vsel %vm215_vm10, %v337_v33, %v212_v43 }
 0x1dd   :  { %v217_v48 = vmul.f32 %v216_v47, %v537_v61  ;;  %v218_v50 = vmul.f32 %v216_v47, %v539_v62 }
 0x1df   :  { %v225_v52 = vmul.f32 %v221_v45, %v217_v48  ;;  %v226_v53 = vmul.f32 %v222_v46, %v218_v50 }
 0x1e1   :  { %v233_v54 = vadd.f32 %v229_v49, %v225_v52  ;;  %v234_v40 = vadd.f32 %v230_v51, %v226_v53 }
 0x1e3   :  { %287 = vmatmul.f32.vlgmr.msra.gmra.mxu2 %v233_v54  ;;  %307 = vmatmul.f32.vlgmr.msra.gmra.mxu3 %v234_v40 }
 0x266   :  { %v288_v56 = vpop.f32.mrf.mxu2  ;;  %v308_v41 = vpop.f32.mrf.mxu3 }
 0x267   :  { %v289_v57 = vadd.f32 %v331_v55, %v288_v56 }
 0x269   :  { %v309_v58 = vadd.f32 %v308_v41, %v289_v57 }
 0x26b   :  { %311 = vst [vmem:[#allocation2] sm:$0xff] %v309_v58 }
 0x26c   :  { %322 = dma.vmem_to_hbm [thread:$0]  %s318_s13, 128, %s320_s16, [#allocation3]  }
 0x26d   :  { %362 = dma.done.wait [#allocation3], 128  }
 0x26e   :  { %363 = vsyncadd [#allocation3], 4294967168 }
 0x26f   :  { %327 = vsyncpa [#allocation3], 1 }

</bundles_post_ra>
